<compile_context>
chip_gen: v5e
topology: v5e:2x2
jax: 0.10.0
libtpu: 0.0.40
codegen_flags: <defaults>
</compile_context>

<pallas_src>
import jax
import jax.numpy as jnp
from jax import lax
from jax.experimental import pallas as pl
from jax.experimental.pallas import tpu as pltpu


_UNROLL_LIMIT = 16  # full static unroll up to this many steps, fori_loop beyond


def _koopman_rollout_kernel(inp_ref, w_ref, out_ref, phi_ref):
    """Whole nb-step Koopman rollout in one invocation.

    inp_ref : (B, D)                input state
    w_ref   : (D + 2K + 3, lanes)   packed weight slab (see wrapper layout)
    out_ref : ((nb+1)*B, D)         [inp; x_1; ...; x_nb] flat along rows
    phi_ref : (nb*B, K)             VMEM scratch holding every phi_i
    """
    b, d = inp_ref.shape
    k = phi_ref.shape[1]
    nb = out_ref.shape[0] // b - 1          # trace-time constant

    # ---- one-time loads from the packed slab (static slices, row offsets) ----
    r_wenc = 0
    r_wmid = d
    r_weff = d + k
    r_benc = d + 2 * k
    r_bmid = r_benc + 1
    r_bdec = r_benc + 2

    w_enc = w_ref[r_wenc:r_wenc + d, 0:k]            # (D, K)
    w_mid = w_ref[r_wmid:r_wmid + k, 0:k]            # (K, K)  decoder folded into encoder
    w_eff = w_ref[r_weff:r_weff + k, 0:d]            # (K, D)  Euler folded into decoder
    b_dec = w_ref[r_bdec:r_bdec + 1, 0:d]            # (1, D)

    # Hoist bias broadcasts out of the loop (JAX does not CSE broadcast_in_dim).
    b_enc_b = jnp.broadcast_to(w_ref[r_benc:r_benc + 1, 0:k], (b, k))
    b_mid_b = jnp.broadcast_to(w_ref[r_bmid:r_bmid + 1, 0:k], (b, k))

    x0 = inp_ref[...].astype(jnp.float32)

    # ---- serial observable recurrence: 1 matmul + 1 tanh per step ----
    phi = jnp.tanh(jnp.dot(x0, w_enc, preferred_element_type=jnp.float32) + b_enc_b)

    if nb <= _UNROLL_LIMIT:
        phi_ref[0:b, :] = phi
        for i in range(1, nb):               # statically unrolled
            phi = jnp.tanh(
                jnp.dot(phi, w_mid, preferred_element_type=jnp.float32) + b_mid_b)
            phi_ref[i * b:(i + 1) * b, :] = phi
    else:
        def body(i, phi_c):
            row = pl.multiple_of(i * b, b)
            phi_ref[pl.ds(row, b), :] = phi_c
            return jnp.tanh(
                jnp.dot(phi_c, w_mid, preferred_element_type=jnp.float32) + b_mid_b)
        phi = lax.fori_loop(0, nb - 1, body, phi)
        phi_ref[(nb - 1) * b:nb * b, :] = phi

    # ---- all nb decodes batched into ONE matmul, off the critical path ----
    x_all = jnp.dot(phi_ref[...], w_eff, preferred_element_type=jnp.float32) + b_dec

    out_ref[0:b, :] = x0                       # torch.stack(pred) includes inp
    out_ref[b:(nb + 1) * b, :] = x_all


def multi_int_net_forward(inp, t0, nb, dt, params):
    """JAX/Pallas equivalent of Multi_INT_net.forward(inp, t0, nb, dt).

    Returns (nb + 1, B, D): [inp, pred_1, ..., pred_nb].
    """
    del t0  # the reference forward passes t0=0.0 to Int_net; unused here
    w_enc, b_enc, kop, w_dec, b_dec = params
    b, d = inp.shape
    k = w_enc.shape[1]

    if nb == 0:                                # empty rollout edge case
        return inp[None].astype(jnp.float32)

    f32 = jnp.float32
    w_enc = w_enc.astype(f32); b_enc = b_enc.astype(f32)
    kop = kop.astype(f32); w_dec = w_dec.astype(f32); b_dec = b_dec.astype(f32)

    # Fuse Euler step into the decoder and the decoder into the next encoder:
    #   x_i       = phi_i @ w_eff + b_dec,        w_eff = (I + dt*K) @ W_dec
    #   phi_{i+1} = tanh(phi_i @ w_mid + b_mid),  w_mid = w_eff @ W_enc
    #                                             b_mid = b_dec @ W_enc + b_enc
    w_eff = w_dec + dt * (kop @ w_dec)           # (K, D)
    w_mid = w_eff @ w_enc                        # (K, K)
    b_mid = b_dec @ w_enc + b_enc                # (1, K)

    # Pack all weights/biases into one lane-padded f32 slab -> 2 input DMAs total.
    lanes = max(d, k)

    def _pad(a):
        return jnp.pad(a.astype(f32), ((0, 0), (0, lanes - a.shape[1])))

    slab = jnp.concatenate(
        [_pad(w_enc), _pad(w_mid), _pad(w_eff), _pad(b_enc), _pad(b_mid), _pad(b_dec)],
        axis=0)                                  # (D + 2K + 3, lanes)

    flops = 2 * b * k * (d + (nb - 1) * k + nb * d)
    cost = pl.CostEstimate(
        flops=flops,
        transcendentals=nb * b * k,
        bytes_accessed=4 * (b * d + slab.shape[0] * lanes + (nb + 1) * b * d))

    vmem = pltpu.MemorySpace.VMEM
    out_flat = pl.pallas_call(
        _koopman_rollout_kernel,
        out_shape=jax.ShapeDtypeStruct(((nb + 1) * b, d), f32),
        in_specs=[pl.BlockSpec(memory_space=vmem),
                  pl.BlockSpec(memory_space=vmem)],
        out_specs=pl.BlockSpec(memory_space=vmem),
        scratch_shapes=[pltpu.VMEM((nb * b, k), f32)],
        cost_estimate=cost,
    )(inp, slab)

    return out_flat.reshape(nb + 1, b, d)        # free metadata reshape


def reference_forward(inp, nb, dt, params):
    """Plain-JAX reference mirroring the PyTorch rollout semantics (unfused)."""
    w_enc, b_enc, kop, w_dec, b_dec = params
    pred = [inp.astype(jnp.float32)]
    for _ in range(nb):
        x = pred[-1]
        phi = jnp.tanh(x @ w_enc + b_enc)
        grad = phi @ kop
        phi_next = phi + dt * grad
        pred.append(phi_next @ w_dec + b_dec)
    return jnp.stack(pred)


def init_params(key, d, k):
    k1, k2, k3, k4, k5 = jax.random.split(key, 5)
    w_enc = 0.3 * jax.random.normal(k1, (d, k), jnp.float32)
    b_enc = 0.1 * jax.random.normal(k2, (1, k), jnp.float32)
    kop = 0.2 * jax.random.normal(k3, (k, k), jnp.float32)
    w_dec = 0.3 * jax.random.normal(k4, (k, d), jnp.float32)
    b_dec = 0.1 * jax.random.normal(k5, (1, d), jnp.float32)
    return (w_enc, b_enc, kop, w_dec, b_dec)


if __name__ == "__main__":
    B, D, K_DIM = 8, 16, 32   # batch, state dim, Koopman observable dim
    NB = 6                    # number of integration steps
    DT = 0.05

    key = jax.random.PRNGKey(0)
    key_x, key_p = jax.random.split(key)
    inp = jax.random.normal(key_x, (B, D), jnp.float32)
    params = init_params(key_p, D, K_DIM)

    out = jax.block_until_ready(multi_int_net_forward(inp, 0.0, NB, DT, params))
    ref = reference_forward(inp, NB, DT, params)
    assert out.shape == (NB + 1, B, D), out.shape
    # Tolerance covers FP reassociation of the wrapper-side weight fusion under
    # the TPU's default matmul precision (shared by kernel and reference dots).
    assert jnp.allclose(out, ref, rtol=3e-2, atol=3e-2), (
        float(jnp.max(jnp.abs(out - ref))))

    # Exercise the long-rollout (lax.fori_loop) code path; its first NB steps
    # run the identical op sequence as the unrolled path, so they must match.
    NB_LONG = 24
    out_long = jax.block_until_ready(
        multi_int_net_forward(inp, 0.0, NB_LONG, DT, params))
    assert out_long.shape == (NB_LONG + 1, B, D), out_long.shape
    assert jnp.allclose(out_long[:NB + 1], out, rtol=1e-4, atol=1e-4), (
        float(jnp.max(jnp.abs(out_long[:NB + 1] - out))))

    # TODO(synk): eig_vals / eig_vects of the Koopman operator (general
    # eigendecomposition) have no Pallas/TPU equivalent; they are discarded by
    # Multi_INT_net.forward, so they are omitted here.
    print("KERNEL_OK")
</pallas_src>

<mosaic_0001>
module attributes {stable_mosaic.version = 11 : i64} {
  func.func @_koopman_rollout_kernel(%arg0: memref<8x16xf32, #tpu.memory_space<vmem>>, %arg1: memref<83x32xf32, #tpu.memory_space<vmem>>, %arg2: memref<56x16xf32, #tpu.memory_space<vmem>>, %arg3: memref<48x32xf32, #tpu.memory_space<vmem>>) attributes {dimension_semantics = [], scalar_prefetch = 0 : i64, scratch_operands = 1 : i64, tpu.core_type = #tpu.core_type<tc>} {
    %c0 = arith.constant 0 : index
    %c0_0 = arith.constant 0 : index
    %0 = vector.load %arg1[%c0, %c0_0] : memref<83x32xf32, #tpu.memory_space<vmem>>, vector<16x32xf32>
    %c16 = arith.constant 16 : index
    %c0_1 = arith.constant 0 : index
    %1 = vector.load %arg1[%c16, %c0_1] : memref<83x32xf32, #tpu.memory_space<vmem>>, vector<32x32xf32>
    %c48 = arith.constant 48 : index
    %c0_2 = arith.constant 0 : index
    %2 = vector.load %arg1[%c48, %c0_2] : memref<83x32xf32, #tpu.memory_space<vmem>>, vector<32x16xf32>
    %c82 = arith.constant 82 : index
    %c0_3 = arith.constant 0 : index
    %3 = vector.load %arg1[%c82, %c0_3] : memref<83x32xf32, #tpu.memory_space<vmem>>, vector<1x16xf32>
    %c80 = arith.constant 80 : index
    %c0_4 = arith.constant 0 : index
    %4 = vector.load %arg1[%c80, %c0_4] : memref<83x32xf32, #tpu.memory_space<vmem>>, vector<1x32xf32>
    %5 = vector.shape_cast %4 : vector<1x32xf32> to vector<1x32xf32>
    %6 = vector.broadcast %5 : vector<1x32xf32> to vector<8x32xf32>
    %c81 = arith.constant 81 : index
    %c0_5 = arith.constant 0 : index
    %7 = vector.load %arg1[%c81, %c0_5] : memref<83x32xf32, #tpu.memory_space<vmem>>, vector<1x32xf32>
    %8 = vector.shape_cast %7 : vector<1x32xf32> to vector<1x32xf32>
    %9 = vector.broadcast %8 : vector<1x32xf32> to vector<8x32xf32>
    %c0_6 = arith.constant 0 : index
    %c0_7 = arith.constant 0 : index
    %10 = vector.load %arg0[%c0_6, %c0_7] : memref<8x16xf32, #tpu.memory_space<vmem>>, vector<8x16xf32>
    %cst = arith.constant dense<0.000000e+00> : vector<8x32xf32>
    %11 = tpu.matmul %10, %0, %cst {dimension_numbers = #tpu.dot_dimension_numbers<[1], [0], [0], [1], [0, 0, 1, 1], [], []>} : vector<8x16xf32>, vector<16x32xf32>, vector<8x32xf32> -> vector<8x32xf32>
    %12 = arith.addf %11, %6 : vector<8x32xf32>
    %13 = math.tanh %12 : vector<8x32xf32>
    %c0_8 = arith.constant 0 : index
    %c0_9 = arith.constant 0 : index
    %14 = vector.load %arg3[%c0_8, %c0_9] : memref<48x32xf32, #tpu.memory_space<vmem>>, vector<8x32xf32>
    tpu.vector_store %arg3[%c0_8, %c0_9], %13 {strides = array<i32>} : memref<48x32xf32, #tpu.memory_space<vmem>>, vector<8x32xf32>,
    %cst_10 = arith.constant dense<0.000000e+00> : vector<8x32xf32>
    %15 = tpu.matmul %13, %1, %cst_10 {dimension_numbers = #tpu.dot_dimension_numbers<[1], [0], [0], [1], [0, 0, 1, 1], [], []>} : vector<8x32xf32>, vector<32x32xf32>, vector<8x32xf32> -> vector<8x32xf32>
    %16 = arith.addf %15, %9 : vector<8x32xf32>
    %17 = math.tanh %16 : vector<8x32xf32>
    %c8 = arith.constant 8 : index
    %c0_11 = arith.constant 0 : index
    %18 = vector.load %arg3[%c8, %c0_11] : memref<48x32xf32, #tpu.memory_space<vmem>>, vector<8x32xf32>
    tpu.vector_store %arg3[%c8, %c0_11], %17 {strides = array<i32>} : memref<48x32xf32, #tpu.memory_space<vmem>>, vector<8x32xf32>,
    %cst_12 = arith.constant dense<0.000000e+00> : vector<8x32xf32>
    %19 = tpu.matmul %17, %1, %cst_12 {dimension_numbers = #tpu.dot_dimension_numbers<[1], [0], [0], [1], [0, 0, 1, 1], [], []>} : vector<8x32xf32>, vector<32x32xf32>, vector<8x32xf32> -> vector<8x32xf32>
    %20 = arith.addf %19, %9 : vector<8x32xf32>
    %21 = math.tanh %20 : vector<8x32xf32>
    %c16_13 = arith.constant 16 : index
    %c0_14 = arith.constant 0 : index
    %22 = vector.load %arg3[%c16_13, %c0_14] : memref<48x32xf32, #tpu.memory_space<vmem>>, vector<8x32xf32>
    tpu.vector_store %arg3[%c16_13, %c0_14], %21 {strides = array<i32>} : memref<48x32xf32, #tpu.memory_space<vmem>>, vector<8x32xf32>,
    %cst_15 = arith.constant dense<0.000000e+00> : vector<8x32xf32>
    %23 = tpu.matmul %21, %1, %cst_15 {dimension_numbers = #tpu.dot_dimension_numbers<[1], [0], [0], [1], [0, 0, 1, 1], [], []>} : vector<8x32xf32>, vector<32x32xf32>, vector<8x32xf32> -> vector<8x32xf32>
    %24 = arith.addf %23, %9 : vector<8x32xf32>
    %25 = math.tanh %24 : vector<8x32xf32>
    %c24 = arith.constant 24 : index
    %c0_16 = arith.constant 0 : index
    %26 = vector.load %arg3[%c24, %c0_16] : memref<48x32xf32, #tpu.memory_space<vmem>>, vector<8x32xf32>
    tpu.vector_store %arg3[%c24, %c0_16], %25 {strides = array<i32>} : memref<48x32xf32, #tpu.memory_space<vmem>>, vector<8x32xf32>,
    %cst_17 = arith.constant dense<0.000000e+00> : vector<8x32xf32>
    %27 = tpu.matmul %25, %1, %cst_17 {dimension_numbers = #tpu.dot_dimension_numbers<[1], [0], [0], [1], [0, 0, 1, 1], [], []>} : vector<8x32xf32>, vector<32x32xf32>, vector<8x32xf32> -> vector<8x32xf32>
    %28 = arith.addf %27, %9 : vector<8x32xf32>
    %29 = math.tanh %28 : vector<8x32xf32>
    %c32 = arith.constant 32 : index
    %c0_18 = arith.constant 0 : index
    %30 = vector.load %arg3[%c32, %c0_18] : memref<48x32xf32, #tpu.memory_space<vmem>>, vector<8x32xf32>
    tpu.vector_store %arg3[%c32, %c0_18], %29 {strides = array<i32>} : memref<48x32xf32, #tpu.memory_space<vmem>>, vector<8x32xf32>,
    %cst_19 = arith.constant dense<0.000000e+00> : vector<8x32xf32>
    %31 = tpu.matmul %29, %1, %cst_19 {dimension_numbers = #tpu.dot_dimension_numbers<[1], [0], [0], [1], [0, 0, 1, 1], [], []>} : vector<8x32xf32>, vector<32x32xf32>, vector<8x32xf32> -> vector<8x32xf32>
    %32 = arith.addf %31, %9 : vector<8x32xf32>
    %33 = math.tanh %32 : vector<8x32xf32>
    %c40 = arith.constant 40 : index
    %c0_20 = arith.constant 0 : index
    %34 = vector.load %arg3[%c40, %c0_20] : memref<48x32xf32, #tpu.memory_space<vmem>>, vector<8x32xf32>
    tpu.vector_store %arg3[%c40, %c0_20], %33 {strides = array<i32>} : memref<48x32xf32, #tpu.memory_space<vmem>>, vector<8x32xf32>,
    %c0_21 = arith.constant 0 : index
    %c0_22 = arith.constant 0 : index
    %35 = vector.load %arg3[%c0_21, %c0_22] : memref<48x32xf32, #tpu.memory_space<vmem>>, vector<48x32xf32>
    %cst_23 = arith.constant dense<0.000000e+00> : vector<48x16xf32>
    %36 = tpu.matmul %35, %2, %cst_23 {dimension_numbers = #tpu.dot_dimension_numbers<[1], [0], [0], [1], [0, 0, 1, 1], [], []>} : vector<48x32xf32>, vector<32x16xf32>, vector<48x16xf32> -> vector<48x16xf32>
    %37 = vector.broadcast %3 : vector<1x16xf32> to vector<48x16xf32>
    %38 = arith.addf %36, %37 : vector<48x16xf32>
    %c0_24 = arith.constant 0 : index
    %c0_25 = arith.constant 0 : index
    %39 = vector.load %arg2[%c0_24, %c0_25] : memref<56x16xf32, #tpu.memory_space<vmem>>, vector<8x16xf32>
    tpu.vector_store %arg2[%c0_24, %c0_25], %10 {strides = array<i32>} : memref<56x16xf32, #tpu.memory_space<vmem>>, vector<8x16xf32>,
    %c8_26 = arith.constant 8 : index
    %c0_27 = arith.constant 0 : index
    %40 = vector.load %arg2[%c8_26, %c0_27] : memref<56x16xf32, #tpu.memory_space<vmem>>, vector<48x16xf32>
    tpu.vector_store %arg2[%c8_26, %c0_27], %38 {strides = array<i32>} : memref<56x16xf32, #tpu.memory_space<vmem>>, vector<48x16xf32>,
    return
  }
}

</mosaic_0001>

<bundles_post_ra>
// kernel: tpu_custom_call.1
= control target key start
LH: loop header
LB: loop body
LE: loop exit
PB: predicated region body
PF: predicated region fallthrough
CT: control target
= control target key end

     0   :  { %vm27_vm0 = vcmask 130048   ;;  %vm52_vm1 = vcmask 261120   ;;  %s395_s1 = inlined_call_operand.vmem [shape: f32[83,32], index: 1, kind: input, shape index: {}]   ;;  %s396_s0 = inlined_call_operand.vmem [shape: f32[8,16], index: 0, kind: input, shape index: {}]   ;;  %s397_s2 = inlined_call_operand.vmem [shape: f32[56,16], index: 2, kind: output, shape index: {}]  }
   0x1   :  { %v12_v0 = vld [vmem:[%s395_s1 + $0x8] sm:$0xff]  ;;  %v11_v1 = vld [vmem:[%s395_s1] sm:$0xff]  ;;  %v14_v5 = vld [vmem:[%s395_s1 + $0x18] sm:$0xff] }
   0x2   :  { %v26_v2 = vld [vmem:[%s396_s0] sm:$0xff]  ;;  %45 = vmatpush.msra.mxu1 %v12_v0  ;;  %v16_v3 = vld [vmem:[%s395_s1 + $0x28] sm:$0xff]  ;;  %v13_v6 = vld [vmem:[%s395_s1 + $0x10] sm:$0xff] }
   0x3   :  { %239 = vst.msk [vmem:[%s397_s2] sm:$0xff] %vm27_vm0, %v26_v2  ;;  %94 = vmatpush.msra.mxu2 %v16_v3  ;;  %v15_v4 = vld [vmem:[%s395_s1 + $0x20] sm:$0xff]  ;;  %119 = vmatpush.msra.mxu3 %v16_v3  ;;  %v270_v7 = vld [vmem:[%s395_s1 + $0x50] ss:$0 sm:$0xff]  ;;  %v334_v11 = vld [vmem:[%s395_s1 + $0x51] ss:$0 sm:$0xff] }
   0x4   :  { %46 = vmatpush.msra.mxu1 %v11_v1  ;;  %144 = vmatpush.msra.mxu0 %v16_v3  ;;  %v20_v15 = vld [vmem:[%s395_s1 + $0x48] sm:$0xff]  ;;  %v19_v16 = vld [vmem:[%s395_s1 + $0x40] sm:$0xff]  ;;  %v18_v17 = vld [vmem:[%s395_s1 + $0x38] sm:$0xff] }
   0x5   :  { %250 = vmatmul.msk.f32.vlgmr.msra.gmra.mxu1 %vm27_vm0, %v26_v2  ;;  %95 = vmatpush.msra.mxu2 %v15_v4  ;;  %v17_v18 = vld [vmem:[%s395_s1 + $0x30] sm:$0xff] }
   0x6   :  { %69 = vmatpush.msrb.mxu1 %v16_v3  ;;  %120 = vmatpush.msra.mxu3 %v15_v4  ;;  %v272_v25 = vld [vmem:[%s395_s1 + $0x52] ss:$0 sm:$0xff] }
   0x7   :  { %145 = vmatpush.msra.mxu0 %v15_v4  ;;  %96 = vmatpush.msra.mxu2 %v14_v5 }
   0x8   :  { %70 = vmatpush.msrb.mxu1 %v15_v4  ;;  %121 = vmatpush.msra.mxu3 %v14_v5 }
   0x9   :  { %146 = vmatpush.msra.mxu0 %v14_v5  ;;  %97 = vmatpush.msra.mxu2 %v13_v6 }
   0xa   :  { %71 = vmatpush.msrb.mxu1 %v14_v5  ;;  %122 = vmatpush.msra.mxu3 %v13_v6 }
   0xb   :  { %147 = vmatpush.msra.mxu0 %v13_v6  ;;  %262 = vmatpush.msrb.mxu2 %v20_v15 }
   0xc   :  { %72 = vmatpush.msrb.mxu1 %v13_v6  ;;  %263 = vmatpush.msrb.mxu3 %v20_v15 }
   0xd   :  { %216 = vmatpush.msrb.mxu0 %v20_v15  ;;  %264 = vmatpush.msrb.mxu2 %v19_v16 }
   0xe   :  { %169 = vmatpush.msra.mxu1 %v16_v3  ;;  %265 = vmatpush.msrb.mxu3 %v19_v16 }
   0xf   :  { %217 = vmatpush.msrb.mxu0 %v19_v16  ;;  %266 = vmatpush.msrb.mxu2 %v18_v17 }
  0x10   :  { %170 = vmatpush.msra.mxu1 %v15_v4  ;;  %267 = vmatpush.msrb.mxu3 %v18_v17 }
  0x11   :  { %218 = vmatpush.msrb.mxu0 %v18_v17  ;;  %268 = vmatpush.msrb.mxu2 %v17_v18 }
  0x12   :  { %171 = vmatpush.msra.mxu1 %v14_v5  ;;  %269 = vmatpush.msrb.mxu3 %v17_v18 }
  0x13   :  { %219 = vmatpush.msrb.mxu0 %v17_v18 }
  0x14   :  { %172 = vmatpush.msra.mxu1 %v13_v6 }
  0x82   :  { %v48_v8 = vpop.f32.mrf.mxu1 }
  0x83   :  { %v49_v9 = vadd.f32 %v270_v7, %v48_v8 }
  0x85   :  { %273 = vtanh.f32 %v49_v9 }
  0x8b   :  { %v274_v10 = vpop.eup %273 }
  0x8c   :  { %53 = vst.msk [vmem:[#allocation2] sm:$0xff] %vm52_vm1, %v274_v10  ;;  %251 = vmatmul.msk.f32.vlgmr.msrb.gmra.mxu1 %vm52_vm1, %v274_v10 }
  0x93   :  { %v179_v29 = vld [vmem:[#allocation2] sm:$0xff] }
 0x109   :  { %v74_v12 = vpop.f32.mrf.mxu1 }
 0x10a   :  { %v75_v13 = vadd.f32 %v334_v11, %v74_v12 }
 0x10c   :  { %275 = vtanh.f32 %v75_v13 }
 0x112   :  { %v276_v14 = vpop.eup %275 }
 0x113   :  { %78 = vst.msk [vmem:[#allocation2 + $0x8] sm:$0xff] %vm52_vm1, %v276_v14  ;;  %252 = vmatmul.msk.f32.vlgmr.msra.gmra.mxu2 %vm52_vm1, %v276_v14 }
 0x11a   :  { %v180_v31 = vld [vmem:[#allocation2 + $0x8] sm:$0xff] }
 0x196   :  { %v99_v19 = vpop.f32.mrf.mxu2 }
 0x197   :  { %v100_v20 = vadd.f32 %v334_v11, %v99_v19 }
 0x199   :  { %277 = vtanh.f32 %v100_v20 }
 0x19f   :  { %v278_v21 = vpop.eup %277 }
 0x1a0   :  { %103 = vst.msk [vmem:[#allocation2 + $0x10] sm:$0xff] %vm52_vm1, %v278_v21  ;;  %253 = vmatmul.msk.f32.vlgmr.msra.gmra.mxu3 %vm52_vm1, %v278_v21 }
 0x1a7   :  { %v181_v22 = vld [vmem:[#allocation2 + $0x10] sm:$0xff] }
 0x1a8   :  { %258 = vmatmul.msk.f32.vlgmr.msrb.gmra.mxu2 %vm52_vm1, %v181_v22 }
 0x223   :  { %v124_v23 = vpop.f32.mrf.mxu3 }
 0x224   :  { %v125_v24 = vadd.f32 %v334_v11, %v124_v23 }
 0x226   :  { %279 = vtanh.f32 %v125_v24 }
 0x22b   :  { %v227_v26 = vpop.f32.mrf.mxu2 }
 0x22c   :  { %v280_v27 = vpop.eup %279  ;;  %v228_v28 = vadd.f32 %v272_v25, %v227_v26 }
 0x22d   :  { %128 = vst.msk [vmem:[#allocation2 + $0x18] sm:$0xff] %vm52_vm1, %v280_v27  ;;  %254 = vmatmul.msk.f32.vlgmr.msra.gmra.mxu0 %vm52_vm1, %v280_v27 }
 0x22e   :  { %242 = vst.msk [vmem:[%s397_s2 + $0x18] sm:$0xff] %vm27_vm0, %v228_v28 }
 0x234   :  { %v182_v30 = vld [vmem:[#allocation2 + $0x18] sm:$0xff] }
 0x235   :  { %256 = vmatmul.msk.f32.vlgmr.msrb.gmra.mxu0 %vm52_vm1, %v179_v29  ;;  %259 = vmatmul.msk.f32.gmra.mxu2 %vm52_vm1, %v182_v30 }
 0x23d   :  { %257 = vmatmul.msk.f32.gmra.mxu0 %vm52_vm1, %v180_v31 }
 0x2aa   :  { %v149_v32 = vpop.f32.mrf.mxu0 }
 0x2ab   :  { %v150_v33 = vadd.f32 %v334_v11, %v149_v32 }
 0x2ad   :  { %281 = vtanh.f32 %v150_v33 }
 0x2b2   :  { %v221_v34 = vpop.f32.mrf.mxu0 }
 0x2b3   :  { %v282_v35 = vpop.eup %281  ;;  %v222_v36 = vadd.f32 %v272_v25, %v221_v34 }
 0x2b4   :  { %153 = vst.msk [vmem:[#allocation2 + $0x20] sm:$0xff] %vm52_vm1, %v282_v35  ;;  %255 = vmatmul.msk.f32.vlgmr.msra.gmra.mxu1 %vm52_vm1, %v282_v35 }
 0x2b5   :  { %240 = vst.msk [vmem:[%s397_s2 + $0x8] sm:$0xff] %vm27_vm0, %v222_v36 }
 0x2b8   :  { %v230_v37 = vpop.f32.mrf.mxu2 }
 0x2b9   :  { %v231_v38 = vadd.f32 %v272_v25, %v230_v37 }
 0x2ba   :  { %v224_v39 = vpop.f32.mrf.mxu0 }
 0x2bb   :  { %243 = vst.msk [vmem:[%s397_s2 + $0x20] sm:$0xff] %vm27_vm0, %v231_v38  ;;  %v225_v40 = vadd.f32 %v272_v25, %v224_v39  ;;  %v183_v41 = vld [vmem:[#allocation2 + $0x20] sm:$0xff] }
 0x2bc   :  { %260 = vmatmul.msk.f32.vlgmr.msrb.gmra.mxu3 %vm52_vm1, %v183_v41 }
 0x2bd   :  { %241 = vst.msk [vmem:[%s397_s2 + $0x10] sm:$0xff] %vm27_vm0, %v225_v40 }
 0x331   :  { %v174_v42 = vpop.f32.mrf.mxu1 }
 0x332   :  { %v175_v43 = vadd.f32 %v334_v11, %v174_v42 }
 0x334   :  { %283 = vtanh.f32 %v175_v43 }
 0x33a   :  { %v284_v44 = vpop.eup %283 }
 0x33b   :  { %178 = vst.msk [vmem:[#allocation2 + $0x28] sm:$0xff] %vm52_vm1, %v284_v44 }
 0x33f   :  { %v233_v45 = vpop.f32.mrf.mxu3 }
 0x340   :  { %v234_v46 = vadd.f32 %v272_v25, %v233_v45 }
 0x342   :  { %244 = vst.msk [vmem:[%s397_s2 + $0x28] sm:$0xff] %vm27_vm0, %v234_v46  ;;  %v184_v47 = vld [vmem:[#allocation2 + $0x28] sm:$0xff] }
 0x343   :  { %261 = vmatmul.msk.f32.gmra.mxu3 %vm52_vm1, %v184_v47 }
 0x3c6   :  { %v236_v48 = vpop.f32.mrf.mxu3 }
 0x3c7   :  { %v237_v49 = vadd.f32 %v272_v25, %v236_v48 }
 0x3c9   :  { %245 = vst.msk [vmem:[%s397_s2 + $0x30] sm:$0xff] %vm27_vm0, %v237_v49 }

</bundles_post_ra>
